<compile_context>
chip_gen: v7x
topology: tpu7x:2x2x1
jax: 0.10.0
libtpu: 0.0.40
codegen_flags: <defaults>
</compile_context>

<pallas_src>
import jax
import jax.numpy as jnp
from jax.experimental import pallas as pl
from jax.experimental.pallas import tpu as pltpu

_LANE = 128


def _stable_softplus(a):
    # softplus(a) = max(a,0) + log(1 + exp(-|a|)).  (log1p avoided: plain log
    # is guaranteed to lower to the EUP and the precision delta is << 1e-6
    # for a mean loss.)
    return jnp.maximum(a, 0.0) + jnp.log(1.0 + jnp.exp(-jnp.abs(a)))


def _vmem_budget():
    """Returns (vmem_limit_bytes, per-input block bytes) for this generation."""
    phys = 64 * 1024 * 1024              # conservative default: v7x per-TC VMEM
    try:                                  # derive per generation when available
        phys = int(pltpu.get_tpu_info().vmem_capacity_bytes)
    except Exception:
        pass
    vmem_limit = min(phys * 3 // 4, 48 * 1024 * 1024)   # <=48 MiB (v7x 64 MiB phys)
    # 2 inputs x 2 pipeline buffers resident, plus headroom for the output
    # block and Mosaic elementwise temporaries.  6 MiB is in the 6-8 MiB sweet
    # spot (per-step overhead <~6% even on v7x) while staying well clear of
    # the scoped-VMEM limit.
    block_bytes = min(6 << 20, max(2 << 20, (vmem_limit - (4 << 20)) // 4))
    return vmem_limit, block_bytes


def _make_bpr_kernel(*, block_rows, width, m_rows, steps_per_split,
                     total_steps, has_phantom):
    last_block = total_steps - 1
    tail_rows = m_rows - last_block * block_rows   # valid rows in last real block
    needs_mask = tail_rows != block_rows
    group = block_rows // 8 if block_rows % 8 == 0 else 0
    acc_rows = 8 if group else 1

    def _reduce_rows(val):
        # Partial reduce along rows each step so the resident accumulator is
        # only (8, width) (or (1, width)) instead of a full input block.
        if group:
            return val.reshape(group, 8, width).sum(axis=0)      # (8, width)
        return jnp.sum(val, axis=0, keepdims=True)               # (1, width)

    def kernel(si_ref, sj_ref, out_ref):
        c = pl.program_id(0)            # split (parallel: one per TensorCore)
        i = pl.program_id(1)            # reduction step within the split
        gb = c * steps_per_split + i    # global row-block index

        @pl.when(i == 0)
        def _init():
            out_ref[...] = jnp.zeros_like(out_ref)

        def _accumulate(mask_tail):
            # -log(sigmoid(si - sj)) == softplus(sj - si); form a = sj - si
            # directly (no extra negations on the VALU slot).
            # TODO(synk): on v6e/v7x, bf16 inputs could subtract natively and
            # cast the difference once; kept cast-first for v5e compatibility.
            a = sj_ref[...].astype(jnp.float32) - si_ref[...].astype(jnp.float32)
            val = _stable_softplus(a)
            if mask_tail:
                row = jax.lax.broadcasted_iota(jnp.int32, (block_rows, 1), 0)
                val = jnp.where(row < tail_rows, val, 0.0)
            out_ref[0, :acc_rows, :] += _reduce_rows(val)

        if needs_mask:
            # Only the single ragged block pays for the iota + select.
            # (Phantom blocks, if any, match neither branch and are skipped.)
            @pl.when(gb == last_block)
            def _tail():
                _accumulate(True)

            @pl.when(gb < last_block)
            def _body():
                _accumulate(False)
        elif has_phantom:
            @pl.when(gb < total_steps)
            def _body():
                _accumulate(False)
        else:
            _accumulate(False)

    return kernel


def _bpr_partial_sums(si, sj):
    """Partial sums of softplus(sj - si) over a lane-dense [m_rows, width] layout."""
    m_rows, width = si.shape
    itemsize = jnp.dtype(si.dtype).itemsize
    vmem_limit, block_bytes = _vmem_budget()

    # Largest row tile (multiple of 8) within the per-input block budget.
    target_rows = max(8, (block_bytes // (width * itemsize)) // 8 * 8)
    block_rows = m_rows if m_rows <= target_rows else target_rows

    total_steps = pl.cdiv(m_rows, block_rows)
    # Leading "parallel" axis shards row blocks across both TensorCores on
    # megacore parts (v7x); single-core chips just run the splits sequentially.
    num_splits = 2 if total_steps >= 2 else 1
    steps_per_split = pl.cdiv(total_steps, num_splits)
    has_phantom = num_splits * steps_per_split > total_steps
    last_block = total_steps - 1

    if has_phantom:
        # Clamp the DMA for the (at most one) phantom step; its accumulation
        # is skipped inside the kernel.
        def in_map(c, i):
            return (jnp.minimum(c * steps_per_split + i, last_block), 0)
    else:
        def in_map(c, i):
            return (c * steps_per_split + i, 0)

    kernel = _make_bpr_kernel(
        block_rows=block_rows, width=width, m_rows=m_rows,
        steps_per_split=steps_per_split, total_steps=total_steps,
        has_phantom=has_phantom)

    return pl.pallas_call(
        kernel,
        out_shape=jax.ShapeDtypeStruct((num_splits, 8, width), jnp.float32),
        grid_spec=pltpu.PrefetchScalarGridSpec(
            num_scalar_prefetch=0,
            grid=(num_splits, steps_per_split),
            in_specs=[
                pl.BlockSpec((block_rows, width), in_map),
                pl.BlockSpec((block_rows, width), in_map),
            ],
            # Lane-dense partial-sum block per split, resident in VMEM across
            # the reduction axis (same block index for every inner step).
            out_specs=pl.BlockSpec((1, 8, width), lambda c, i: (c, 0, 0)),
        ),
        compiler_params=pltpu.CompilerParams(
            dimension_semantics=("parallel", "arbitrary"),
            vmem_limit_bytes=vmem_limit,
        ),
    )(si, sj)


def bpr_loss(score_i: jax.Array, score_j: jax.Array) -> jax.Array:
    """Pallas BPRLoss.forward: -log(sigmoid(score_i - score_j)).mean() -> f32."""
    assert score_i.shape == score_j.shape
    n_total = score_i.size
    assert n_total > 0

    # Elementwise + global mean: flatten to a lane-dense 2-D layout (free
    # layout plumbing for contiguous arrays) so no lanes / VMEM are wasted.
    si_flat = score_i.reshape(-1)
    sj_flat = score_j.reshape(-1)

    width = 0
    for w in (1024, 512, 256, _LANE):
        if n_total >= w and n_total % w == 0:
            width = w
            break
    if width:
        main = n_total
    else:
        main = (n_total // _LANE) * _LANE
        width = _LANE

    total = jnp.float32(0.0)
    if main < n_total:
        # <128 leftover elements: negligible work, handled with plain jnp.
        a = (sj_flat[main:].astype(jnp.float32)
             - si_flat[main:].astype(jnp.float32))
        total = total + jnp.sum(_stable_softplus(a))

    if main > 0:
        si2 = (si_flat if main == n_total else si_flat[:main]).reshape(-1, width)
        sj2 = (sj_flat if main == n_total else sj_flat[:main]).reshape(-1, width)
        total = total + jnp.sum(_bpr_partial_sums(si2, sj2))

    return (total / jnp.float32(n_total)).astype(jnp.float32)


if __name__ == "__main__":
    # Small deterministic inputs: 64 "users" x 128 "item pairs" of scores.
    key = jax.random.PRNGKey(0)
    k_i, k_j = jax.random.split(key)
    shape = (64, 128)
    score_i = jax.random.normal(k_i, shape, dtype=jnp.float32)
    score_j = jax.random.normal(k_j, shape, dtype=jnp.float32)

    loss = jax.block_until_ready(bpr_loss(score_i, score_j))

    # Pure-JAX reference check (same math as the PyTorch module).
    ref = -jnp.mean(jnp.log(jax.nn.sigmoid(score_i - score_j)))
    assert jnp.allclose(loss, ref, rtol=1e-5, atol=1e-5), (loss, ref)

    print("KERNEL_OK")
</pallas_src>

<mosaic_0001>
module attributes {stable_mosaic.version = 11 : i64} {
  func.func @kernel(%arg0: i32, %arg1: i32, %arg2: memref<8x1024xf32, #tpu.memory_space<vmem>>, %arg3: memref<8x1024xf32, #tpu.memory_space<vmem>>, %arg4: memref<1x8x1024xf32, #tpu.memory_space<vmem>>) attributes {dimension_semantics = [#tpu.dimension_semantics<parallel>, #tpu.dimension_semantics<arbitrary>], iteration_bounds = array<i64: 1, 1>, scalar_prefetch = 0 : i64, scratch_operands = 0 : i64, tpu.core_type = #tpu.core_type<tc>, window_params = [{transform_indices = @transform_0, window_bounds = array<i64: 8, 1024>}, {transform_indices = @transform_1, window_bounds = array<i64: 8, 1024>}, {transform_indices = @transform_2, window_bounds = array<i64: 1, 8, 1024>}]} {
    %c0_i32 = arith.constant 0 : i32
    %0 = arith.cmpi eq, %arg1, %c0_i32 : i32
    %1 = arith.extui %0 : i1 to i32
    %c0_i32_0 = arith.constant 0 : i32
    %2 = arith.cmpi ne, %1, %c0_i32_0 : i32
    scf.if %2 {
      %cst_13 = arith.constant 0.000000e+00 : f32
      %24 = vector.broadcast %cst_13 : f32 to vector<1x8x1024xf32>
      %c0_14 = arith.constant 0 : index
      %c0_15 = arith.constant 0 : index
      %c0_16 = arith.constant 0 : index
      %25 = vector.load %arg4[%c0_14, %c0_15, %c0_16] : memref<1x8x1024xf32, #tpu.memory_space<vmem>>, vector<1x8x1024xf32>
      tpu.vector_store %arg4[%c0_14, %c0_15, %c0_16], %24 {strides = array<i32>} : memref<1x8x1024xf32, #tpu.memory_space<vmem>>, vector<1x8x1024xf32>,
    } else {
    }
    %c0 = arith.constant 0 : index
    %c0_1 = arith.constant 0 : index
    %3 = vector.load %arg3[%c0, %c0_1] : memref<8x1024xf32, #tpu.memory_space<vmem>>, vector<8x1024xf32>
    %c0_2 = arith.constant 0 : index
    %c0_3 = arith.constant 0 : index
    %4 = vector.load %arg2[%c0_2, %c0_3] : memref<8x1024xf32, #tpu.memory_space<vmem>>, vector<8x1024xf32>
    %5 = arith.subf %3, %4 : vector<8x1024xf32>
    %cst = arith.constant 0.000000e+00 : f32
    %6 = vector.broadcast %cst : f32 to vector<8x1024xf32>
    %7 = arith.maximumf %5, %6 : vector<8x1024xf32>
    %8 = math.absf %5 : vector<8x1024xf32>
    %cst_4 = arith.constant 0.000000e+00 : f32
    %9 = vector.broadcast %cst_4 : f32 to vector<8x1024xf32>
    %10 = arith.subf %9, %8 : vector<8x1024xf32>
    %11 = math.exp %10 : vector<8x1024xf32>
    %cst_5 = arith.constant 1.000000e+00 : f32
    %12 = vector.broadcast %cst_5 : f32 to vector<8x1024xf32>
    %13 = arith.addf %12, %11 : vector<8x1024xf32>
    %14 = math.log %13 : vector<8x1024xf32>
    %15 = arith.addf %7, %14 : vector<8x1024xf32>
    %c0_6 = arith.constant 0 : index
    %c0_7 = arith.constant 0 : index
    %c0_8 = arith.constant 0 : index
    %16 = vector.load %arg4[%c0_6, %c0_7, %c0_8] : memref<1x8x1024xf32, #tpu.memory_space<vmem>>, vector<1x8x1024xf32>
    %17 = vector.shape_cast %16 : vector<1x8x1024xf32> to vector<8x1024xf32>
    %18 = vector.shape_cast %15 : vector<8x1024xf32> to vector<1x8x1024xf32>
    %cst_9 = arith.constant dense<0.000000e+00> : vector<8x1024xf32>
    %19 = vector.multi_reduction <add>, %18, %cst_9 [0] : vector<1x8x1024xf32> to vector<8x1024xf32>
    %20 = arith.addf %17, %19 : vector<8x1024xf32>
    %c0_10 = arith.constant 0 : index
    %c0_11 = arith.constant 0 : index
    %c0_12 = arith.constant 0 : index
    %21 = vector.load %arg4[%c0_10, %c0_11, %c0_12] : memref<1x8x1024xf32, #tpu.memory_space<vmem>>, vector<1x8x1024xf32>
    %22 = vector.shape_cast %21 : vector<1x8x1024xf32> to vector<8x1024xf32>
    %23 = vector.shape_cast %20 : vector<8x1024xf32> to vector<1x8x1024xf32>
    tpu.vector_store %arg4[%c0_10, %c0_11, %c0_12], %23 {strides = array<i32>} : memref<1x8x1024xf32, #tpu.memory_space<vmem>>, vector<1x8x1024xf32>,
    return
  }
  func.func @transform_0(%arg0: i32, %arg1: i32) -> (i32, i32) {
    %c1_i32 = arith.constant 1 : i32
    %0 = arith.muli %arg0, %c1_i32 : i32
    %1 = arith.addi %0, %arg1 : i32
    %c0_i32 = arith.constant 0 : i32
    %c0_i32_0 = arith.constant 0 : i32
    return %1, %c0_i32 : i32, i32
  }
  func.func @transform_1(%arg0: i32, %arg1: i32) -> (i32, i32) {
    %c1_i32 = arith.constant 1 : i32
    %0 = arith.muli %arg0, %c1_i32 : i32
    %1 = arith.addi %0, %arg1 : i32
    %c0_i32 = arith.constant 0 : i32
    %c0_i32_0 = arith.constant 0 : i32
    return %1, %c0_i32 : i32, i32
  }
  func.func @transform_2(%arg0: i32, %arg1: i32) -> (i32, i32, i32) {
    %c0_i32 = arith.constant 0 : i32
    %c0_i32_0 = arith.constant 0 : i32
    %c0_i32_1 = arith.constant 0 : i32
    return %arg0, %c0_i32, %c0_i32_0 : i32, i32, i32
  }
}

</mosaic_0001>

<bundles_post_ra>
// kernel: tpu_custom_call.1
= control target key start
LH: loop header
LB: loop body
LE: loop exit
PB: predicated region body
PF: predicated region fallthrough
CT: control target
= control target key end

     0   :  { %7 = vsyncpa [#allocation3], 0  ;;  %s396_s0 = inlined_call_operand.hbm [shape: f32[8,1024], index: 0, kind: input, shape index: {}]   ;;  %s397_s1 = inlined_call_operand.hbm [shape: f32[8,1024], index: 1, kind: input, shape index: {}]   ;;  %s398_s2 = inlined_call_operand.hbm [shape: f32[1,8,1024], index: 2, kind: output, shape index: {}]  }
   0x1   :  { %8 = vsyncpa [#allocation6], 0 }
   0x2   :  { %9 = vsyncpa [#allocation4], 0  ;;  %s310_s9 = smov [#allocation2]   ;;  %s311_s11 = smov [#allocation5]  }
   0x3   :  { %s20_s10 = sshll.u32 %s310_s9, 4  ;;  %s34_s12 = sshll.u32 %s311_s11, 4  ;;  %s21_s10 = int_to_ptr.vmem [resolvable:$true] %s20_s10  ;;  %s35_s12 = int_to_ptr.vmem [resolvable:$true] %s34_s12 }
   0x4   :  { %s238_s15 = scalar_lea.hbm %s396_s0, 1024 }
   0x5   :  { %p239_p0 = scmp.ne.s32.totalorder %s396_s0, %s238_s15  ;;  %p242_p1 = scmp.lt.u32.totalorder %s238_s15, %s396_s0 }
   0x7   :  { %p244_p2 = pnand %p242_p1, %p239_p0 }
   0x9   :  { %247 = shalt.err (!%p244_p2)
}
   0xa   :  { %s248_s20 = scalar_lea.vmem %s21_s10, 1024  ;;  %p253_p4 = scmp.lt.s32.totalorder %s21_s10, %s21_s10 }
   0xb   :  { %p249_p3 = scmp.ne.s32.totalorder %s21_s10, %s248_s20  ;;  %p254_p5 = scmp.lt.s32.totalorder %s248_s20, %s248_s20 }
   0xd   :  { %p255_p6 = por %p254_p5, %p253_p4 }
   0xf   :  { %p256_p7 = pnand %p255_p6, %p249_p3 }
  0x11   :  { %259 = shalt.err (!%p256_p7)
}
  0x12   :  { %23 = dma.hbm_to_vmem [thread:$0]  %s396_s0, 1024, %s21_s10, [#allocation3]  }
  0x13   :  { %s260_s25 = scalar_lea.hbm %s397_s1, 1024 }
  0x14   :  { %p261_p8 = scmp.ne.s32.totalorder %s397_s1, %s260_s25  ;;  %p264_p9 = scmp.lt.u32.totalorder %s260_s25, %s397_s1 }
  0x16   :  { %p266_p10 = pnand %p264_p9, %p261_p8 }
  0x18   :  { %269 = shalt.err (!%p266_p10)
}
  0x19   :  { %s270_s30 = scalar_lea.vmem %s35_s12, 1024  ;;  %p275_p12 = scmp.lt.s32.totalorder %s35_s12, %s35_s12 }
  0x1a   :  { %p271_p11 = scmp.ne.s32.totalorder %s35_s12, %s270_s30  ;;  %p276_p13 = scmp.lt.s32.totalorder %s270_s30, %s270_s30 }
  0x1c   :  { %p277_p0 = por %p276_p13, %p275_p12 }
  0x1e   :  { %p278_p1 = pnand %p277_p0, %p271_p11 }
  0x20   :  { %281 = shalt.err (!%p278_p1)
}
  0x21   :  { %37 = dma.hbm_to_vmem [thread:$0]  %s397_s1, 1024, %s35_s12, [#allocation6]  }
  0x22   :  { %304 = dma.done.wait [#allocation3], 1024  }
  0x23   :  { %305 = vsyncadd [#allocation3], 4294966272 }
  0x24   :  { %306 = dma.done.wait [#allocation6], 1024  }
  0x25   :  { %307 = vsyncadd [#allocation6], 4294966272  ;;  %v58_v0 = vld [vmem:[#allocation5] sm:$0xff]  ;;  %v59_v2 = vld [vmem:[#allocation5 + $0x8] sm:$0xff]  ;;  %s312_s1 = smov [#allocation7]  }
  0x26   :  { %v66_v1 = vld [vmem:[#allocation2] sm:$0xff]  ;;  %v67_v4 = vld [vmem:[#allocation2 + $0x8] sm:$0xff]  ;;  %v60_v5 = vld [vmem:[#allocation5 + $0x10] sm:$0xff]  ;;  %s192_s4 = sshll.u32 %s312_s1, 4  ;;  %s193_s4 = int_to_ptr.vmem [resolvable:$true] %s192_s4 }
  0x27   :  { %v352_v3 = vsub.f32 %v58_v0, %v66_v1  ;;  %v68_v6 = vld [vmem:[#allocation2 + $0x10] sm:$0xff]  ;;  %v354_v7 = vsub.f32 %v59_v2, %v67_v4  ;;  %v61_v9 = vld [vmem:[#allocation5 + $0x18] sm:$0xff]  ;;  %v62_v11 = vld [vmem:[#allocation5 + $0x20] sm:$0xff]  ;;  %s282_s5 = scalar_lea.vmem %s193_s4, 1024  ;;  %p287_p3 = scmp.lt.s32.totalorder %s193_s4, %s193_s4 }
  0x28   :  { %v356_v8 = vsub.f32 %v60_v5, %v68_v6  ;;  %v69_v10 = vld [vmem:[#allocation2 + $0x18] sm:$0xff]  ;;  %v70_v14 = vld [vmem:[#allocation2 + $0x20] sm:$0xff]  ;;  %v63_v15 = vld [vmem:[#allocation5 + $0x28] sm:$0xff]  ;;  %p283_p2 = scmp.ne.s32.totalorder %s193_s4, %s282_s5  ;;  %p288_p4 = scmp.lt.s32.totalorder %s282_s5, %s282_s5 }
  0x29   :  { %v90_v12 = vand.u32 2147483647, %v352_v3  ;;  %v359_v13 = vsub.f32 %v61_v9, %v69_v10  ;;  %v71_v16 = vld [vmem:[#allocation2 + $0x28] sm:$0xff]  ;;  %v91_v17 = vand.u32 2147483647, %v354_v7  ;;  %v364_v21 = vsub.f32 %v62_v11, %v70_v14  ;;  %v64_v22 = vld [vmem:[#allocation5 + $0x30] sm:$0xff] }
  0x2a   :  { %v92_v18 = vand.u32 2147483647, %v356_v8  ;;  %v72_v23 = vld [vmem:[#allocation2 + $0x30] sm:$0xff]  ;;  %v366_v26 = vsub.f32 %v63_v15, %v71_v16  ;;  %v65_v28 = vld [vmem:[#allocation5 + $0x38] sm:$0xff]  ;;  %v82_v0 = vmax.f32 %v352_v3, 0.0  ;;  %v83_v2 = vmax.f32 %v354_v7, 0.0  ;;  %p289_p5 = por %p288_p4, %p287_p3 }
  0x2b   :  { %v98_v19 = vsub.f32 0.0, %v90_v12  ;;  %v93_v20 = vand.u32 2147483647, %v359_v13  ;;  %v99_v24 = vsub.f32 0.0, %v91_v17  ;;  %v368_v27 = vsub.f32 %v64_v22, %v72_v23  ;;  %v73_v32 = vld [vmem:[#allocation2 + $0x38] sm:$0xff] }
  0x2c   :  { %v100_v25 = vsub.f32 0.0, %v92_v18  ;;  %v94_v31 = vand.u32 2147483647, %v364_v21  ;;  %v95_v37 = vand.u32 2147483647, %v366_v26  ;;  %v373_v39 = vsub.f32 %v65_v28, %v73_v32  ;;  %p290_p6 = pnand %p289_p5, %p283_p2 }
  0x2d   :  { %v106_v29 = vmul.f32 1.442695, %v98_v19  ;;  %v101_v30 = vsub.f32 0.0, %v93_v20  ;;  %v108_v33 = vmul.f32 1.442695, %v99_v24  ;;  %v84_v6 = vmax.f32 %v356_v8, 0.0 }
  0x2e   :  { %v110_v34 = vmul.f32 1.442695, %v100_v25  ;;  %v102_v36 = vsub.f32 0.0, %v94_v31  ;;  %v96_v38 = vand.u32 2147483647, %v368_v27  ;;  %v103_v41 = vsub.f32 0.0, %v95_v37 }
  0x2f   :  { %206 = vpow2.f32 %v106_v29  ;;  %v112_v35 = vmul.f32 1.442695, %v101_v30  ;;  %v97_v43 = vand.u32 2147483647, %v373_v39  ;;  %v85_v11 = vmax.f32 %v359_v13, 0.0 }
  0x30   :  { %208 = vpow2.f32 %v108_v33  ;;  %v114_v40 = vmul.f32 1.442695, %v102_v36  ;;  %v104_v42 = vsub.f32 0.0, %v96_v38  ;;  %v116_v44 = vmul.f32 1.442695, %v103_v41 }
  0x31   :  { %210 = vpow2.f32 %v110_v34  ;;  %v105_v46 = vsub.f32 0.0, %v97_v43  ;;  %v86_v16 = vmax.f32 %v364_v21, 0.0  ;;  %v87_v7 = vmax.f32 %v366_v26, 0.0 }
  0x32   :  { %212 = vpow2.f32 %v112_v35  ;;  %v118_v45 = vmul.f32 1.442695, %v104_v42  ;;  %v88_v8 = vmax.f32 %v368_v27, 0.0  ;;  %v89_v29 = vmax.f32 %v373_v39, 0.0 }
  0x33   :  { %214 = vpow2.f32 %v114_v40  ;;  %v120_v47 = vmul.f32 1.442695, %v105_v46 }
  0x34   :  { %216 = vpow2.f32 %v116_v44 }
  0x35   :  { %218 = vpow2.f32 %v118_v45 }
  0x36   :  { %220 = vpow2.f32 %v120_v47 }
  0x39   :  { %v207_v48 = vpop.eup %206 }
  0x3a   :  { %v209_v49 = vpop.eup %208  ;;  %v122_v50 = vadd.f32 1.0, %v207_v48 }
  0x3b   :  { %v211_v51 = vpop.eup %210  ;;  %v123_v52 = vadd.f32 1.0, %v209_v49 }
  0x3c   :  { %v213_v53 = vpop.eup %212  ;;  %222 = vlog2.f32 %v122_v50  ;;  %v124_v54 = vadd.f32 1.0, %v211_v51 }
  0x3d   :  { %v215_v55 = vpop.eup %214  ;;  %224 = vlog2.f32 %v123_v52  ;;  %v125_v56 = vadd.f32 1.0, %v213_v53 }
  0x3e   :  { %226 = vlog2.f32 %v124_v54  ;;  %v126_v57 = vadd.f32 1.0, %v215_v55  ;;  %v217_v58 = vpop.eup %216 }
  0x3f   :  { %228 = vlog2.f32 %v125_v56  ;;  %v219_v59 = vpop.eup %218  ;;  %v127_v60 = vadd.f32 1.0, %v217_v58 }
  0x40   :  { %230 = vlog2.f32 %v126_v57  ;;  %v128_v61 = vadd.f32 1.0, %v219_v59  ;;  %v221_v62 = vpop.eup %220 }
  0x41   :  { %232 = vlog2.f32 %v127_v60  ;;  %v129_v63 = vadd.f32 1.0, %v221_v62 }
  0x42   :  { %234 = vlog2.f32 %v128_v61 }
  0x43   :  { %236 = vlog2.f32 %v129_v63 }
  0x46   :  { %v223_v1 = vpop.eup %222 }
  0x47   :  { %v225_v4 = vpop.eup %224  ;;  %v131_v5 = vmul.f32 0.6931472, %v223_v1 }
  0x48   :  { %v227_v9 = vpop.eup %226  ;;  %v133_v10 = vmul.f32 0.6931472, %v225_v4 }
  0x49   :  { %v229_v12 = vpop.eup %228  ;;  %v146_v14 = vadd.f32 %v131_v5, %v82_v0  ;;  %v135_v15 = vmul.f32 0.6931472, %v227_v9 }
  0x4a   :  { %v231_v17 = vpop.eup %230  ;;  %v147_v18 = vadd.f32 %v133_v10, %v83_v2  ;;  %v137_v3 = vmul.f32 0.6931472, %v229_v12 }
  0x4b   :  { %v148_v19 = vadd.f32 %v135_v15, %v84_v6  ;;  %v139_v20 = vmul.f32 0.6931472, %v231_v17  ;;  %v233_v22 = vpop.eup %232  ;;  %178 = vst [vmem:[#allocation7] sm:$0xff] %v146_v14 }
  0x4c   :  { %v149_v23 = vadd.f32 %v137_v3, %v85_v11  ;;  %v235_v24 = vpop.eup %234  ;;  %v141_v13 = vmul.f32 0.6931472, %v233_v22  ;;  %179 = vst [vmem:[#allocation7 + $0x8] sm:$0xff] %v147_v18 }
  0x4d   :  { %v150_v25 = vadd.f32 %v139_v20, %v86_v16  ;;  %v143_v28 = vmul.f32 0.6931472, %v235_v24  ;;  %v237_v21 = vpop.eup %236  ;;  %180 = vst [vmem:[#allocation7 + $0x10] sm:$0xff] %v148_v19 }
  0x4e   :  { %v151_v30 = vadd.f32 %v141_v13, %v87_v7  ;;  %181 = vst [vmem:[#allocation7 + $0x18] sm:$0xff] %v149_v23  ;;  %v145_v32 = vmul.f32 0.6931472, %v237_v21 }
  0x4f   :  { %v152_v31 = vadd.f32 %v143_v28, %v88_v8  ;;  %182 = vst [vmem:[#allocation7 + $0x20] sm:$0xff] %v150_v25 }
  0x50   :  { %v153_v26 = vadd.f32 %v145_v32, %v89_v29  ;;  %183 = vst [vmem:[#allocation7 + $0x28] sm:$0xff] %v151_v30 }
  0x51   :  { %184 = vst [vmem:[#allocation7 + $0x30] sm:$0xff] %v152_v31 }
  0x52   :  { %185 = vst [vmem:[#allocation7 + $0x38] sm:$0xff] %v153_v26 }
  0x53   :  { %293 = shalt.err (!%p290_p6)
}
  0x54   :  { %s294_s8 = scalar_lea.hbm %s398_s2, 1024 }
  0x55   :  { %p295_p7 = scmp.ne.s32.totalorder %s398_s2, %s294_s8  ;;  %p298_p8 = scmp.lt.u32.totalorder %s294_s8, %s398_s2 }
  0x57   :  { %p300_p9 = pnand %p298_p8, %p295_p7 }
  0x59   :  { %303 = shalt.err (!%p300_p9)
}
  0x5a   :  { %195 = dma.vmem_to_hbm [thread:$0]  %s193_s4, 1024, %s398_s2, [#allocation4]  }
  0x5b   :  { %308 = dma.done.wait [#allocation4], 1024  }
  0x5c   :  { %309 = vsyncadd [#allocation4], 4294966272 }
  0x5d   :  { %199 = vsyncpa [#allocation3], 1 }
  0x5e   :  { %200 = vsyncpa [#allocation6], 1 }
  0x5f   :  { %201 = vsyncpa [#allocation4], 1 }

</bundles_post_ra>
